<compile_context>
chip_gen: v5e
topology: v5e:2x2
jax: 0.10.0
libtpu: 0.0.40
codegen_flags: <defaults>
</compile_context>

<pallas_src>
import math

import jax
import jax.numpy as jnp
from jax.experimental import pallas as pl
from jax.experimental.pallas import tpu as pltpu


_VMEM_LIMIT = 40 * 1024 * 1024        # below v7x's 64 MiB physical VMEM
_RESIDENT_BUDGET = 24 * 1024 * 1024   # target resident set for the main matmul


def _round_up(x, m):
    return ((x + m - 1) // m) * m


# ---------------------------------------------------------------------------
# Kernels
# ---------------------------------------------------------------------------

def _small_matmul_kernel(x_ref, w_ref, o_ref):
    # Whole (tiny) problem in one block: support = x @ W, emitted in bf16.
    o_ref[...] = jnp.dot(
        x_ref[...], w_ref[...], preferred_element_type=jnp.float32
    ).astype(o_ref.dtype)


def _adj_matmul_resident_kernel(a_ref, b_ref, o_ref):
    # B (= support) is fully VMEM-resident and its block index never changes,
    # so there is a single contraction step: no accumulator scratch, no
    # init/finalize pl.when, direct lane-dense store.
    o_ref[...] = jnp.dot(
        a_ref[...], b_ref[...], preferred_element_type=jnp.float32
    ).astype(o_ref.dtype)


def _adj_matmul_ktiled_kernel(a_ref, b_ref, o_ref, acc_ref):
    # Fallback when support is too large for VMEM: accumulate over the K grid
    # axis; the cast + store is gated on the LAST K step only, freeing the
    # vector-store slot on every other iteration (biggest win on v5e).
    @pl.when(pl.program_id(2) == 0)
    def _():
        acc_ref[...] = jnp.zeros_like(acc_ref)

    acc_ref[...] += jnp.dot(
        a_ref[...], b_ref[...], preferred_element_type=jnp.float32
    )

    @pl.when(pl.program_id(2) == pl.num_programs(2) - 1)
    def _():
        o_ref[...] = acc_ref[...].astype(o_ref.dtype)


# ---------------------------------------------------------------------------
# Wrappers
# ---------------------------------------------------------------------------

def _support_matmul(x, w_padded):
    """support = x @ W (tiny): one full-block Pallas call, bf16 output."""
    n, fin = x.shape
    fp = w_padded.shape[1]
    vmem_bytes = 2 * (n * fin * 4 + fin * fp * 4 + n * fp * 2)
    if vmem_bytes > 16 * 1024 * 1024:
        # This matmul is negligible next to adj @ support; for very large N
        # just let XLA handle it instead of padding Fin up to a 128-wide tile.
        return jnp.dot(
            x, w_padded, preferred_element_type=jnp.float32
        ).astype(jnp.bfloat16)
    return pl.pallas_call(
        _small_matmul_kernel,
        out_shape=jax.ShapeDtypeStruct((n, fp), jnp.bfloat16),
        grid=(1,),
        in_specs=[
            pl.BlockSpec((n, fin), lambda i: (0, 0)),   # full-extent block
            pl.BlockSpec((fin, fp), lambda i: (0, 0)),  # full-extent block
        ],
        out_specs=pl.BlockSpec((n, fp), lambda i: (0, 0)),
        compiler_params=pltpu.CompilerParams(vmem_limit_bytes=_VMEM_LIMIT),
    )(x, w_padded)


def _pick_row_tile(mp, k, fp, *, sublane=16, max_tm=512,
                   budget=_RESIDENT_BUDGET):
    """Largest row tile (multiple of `sublane`, dividing mp, <= max_tm) whose
    double-buffered resident set fits `budget`; prefers >= 2 row tiles so both
    v7x TensorCores are used.  Returns None if nothing fits (fallback path)."""
    fixed = 2 * k * fp * 2                 # resident support (bf16, dbuf)
    per_row = 2 * k * 2 + 2 * fp * 4       # adj stripe (bf16) + out (f32), dbuf

    def fits(tm):
        return fixed + tm * per_row <= budget

    cands = [t for t in range(sublane, min(max_tm, mp) + 1, sublane)
             if mp % t == 0 and fits(t)]
    if not cands:
        return None
    tm = max(cands)
    if tm == mp:
        # Single row tile would idle one TensorCore on v7x; split if possible.
        halves = [t for t in cands if t <= mp // 2]
        if halves:
            tm = max(halves)
    return tm


def _adj_matmul(adj_b, support_b):
    """output = adj @ support in f32.  adj_b: (Mp, K) bf16, support_b: (K, Fp) bf16."""
    mp, k = adj_b.shape
    k2, fp = support_b.shape
    assert k == k2

    tm = _pick_row_tile(mp, k, fp)
    if tm is not None:
        return pl.pallas_call(
            _adj_matmul_resident_kernel,
            out_shape=jax.ShapeDtypeStruct((mp, fp), jnp.float32),
            grid_spec=pltpu.PrefetchScalarGridSpec(
                num_scalar_prefetch=0,
                grid=(mp // tm,),
                in_specs=[
                    # adj row stripe, full-K block (adj is never padded on K).
                    pl.BlockSpec((tm, k), lambda i: (i, 0)),
                    # support: block index invariant in i -> DMA'd once and
                    # resident in VMEM for the whole kernel.
                    pl.BlockSpec((k, fp), lambda i: (0, 0)),
                ],
                out_specs=pl.BlockSpec((tm, fp), lambda i: (i, 0)),
            ),
            compiler_params=pltpu.CompilerParams(
                dimension_semantics=("parallel",),
                vmem_limit_bytes=_VMEM_LIMIT,
            ),
        )(adj_b, support_b)

    # ---- Fallback: support too large for VMEM -> K-tiled accumulation. ----
    # Only reached for very large graphs; padding adj is unavoidable here.
    tm_f = 256
    tn_f = 256 if fp % 256 == 0 else 128
    tk_f = 2048
    mpp, kp = _round_up(mp, tm_f), _round_up(k, tk_f)
    a, b = adj_b, support_b
    if (mpp, kp) != (mp, k):
        a = jnp.pad(a, ((0, mpp - mp), (0, kp - k)))
    if kp != k:
        b = jnp.pad(b, ((0, kp - k), (0, 0)))
    out = pl.pallas_call(
        _adj_matmul_ktiled_kernel,
        out_shape=jax.ShapeDtypeStruct((mpp, fp), jnp.float32),
        grid_spec=pltpu.PrefetchScalarGridSpec(
            num_scalar_prefetch=0,
            grid=(mpp // tm_f, fp // tn_f, kp // tk_f),
            in_specs=[
                pl.BlockSpec((tm_f, tk_f), lambda i, j, kk: (i, kk)),
                pl.BlockSpec((tk_f, tn_f), lambda i, j, kk: (kk, j)),
            ],
            out_specs=pl.BlockSpec((tm_f, tn_f), lambda i, j, kk: (i, j)),
            scratch_shapes=[pltpu.VMEM((tm_f, tn_f), jnp.float32)],
        ),
        compiler_params=pltpu.CompilerParams(
            dimension_semantics=("parallel", "parallel", "arbitrary"),
            vmem_limit_bytes=_VMEM_LIMIT,
        ),
    )(a, b)
    return out[:mp]


@jax.jit
def graph_convolution2(x, adj, weight):
    """Forward of GraphConvolution2: adj @ (x @ weight). Bias is unused (matches PyTorch)."""
    n, fin = x.shape
    assert adj.shape == (n, n)
    fin2, fout = weight.shape
    assert fin2 == fin

    # Pad only the SMALL operand (weight) so support / output columns are a
    # lane-dense multiple of 128 (unmasked stores); slice back at the end.
    fp = _round_up(fout, 128)
    w = weight.astype(jnp.float32)
    if fp != fout:
        w = jnp.pad(w, ((0, 0), (0, fp - fout)))

    # support = x @ W  (tiny) -> emitted directly in bf16 for the MXU.
    support = _support_matmul(x.astype(jnp.float32), w)

    # adj -> bf16 once (halves HBM bytes of the bandwidth-bound matmul; in a
    # multi-layer GCN this one-time cast is amortized across layers).  Rows
    # are padded only if N is not a multiple of the bf16 sublane tile (16).
    adj_b = adj.astype(jnp.bfloat16)
    mp = _round_up(n, 16)
    if mp != n:
        adj_b = jnp.pad(adj_b, ((0, mp - n), (0, 0)))

    out = _adj_matmul(adj_b, support)       # (mp, fp) f32
    return out[:n, :fout]


def init_params(key, in_features, out_features):
    # Matches PyTorch reset_parameters: uniform(-stdv, stdv), stdv = 1/sqrt(out)
    stdv = 1.0 / math.sqrt(out_features)
    kw, kb = jax.random.split(key)
    weight = jax.random.uniform(
        kw, (in_features, out_features), jnp.float32, minval=-stdv, maxval=stdv
    )
    bias = jax.random.uniform(
        kb, (out_features,), jnp.float32, minval=-stdv, maxval=stdv
    )  # unused in forward (kept for parity with the PyTorch module)
    return weight, bias


if __name__ == "__main__":
    key = jax.random.PRNGKey(0)
    k_x, k_adj, k_param = jax.random.split(key, 3)

    n_nodes = 64
    in_features = 16
    out_features = 32

    x = jax.random.normal(k_x, (n_nodes, in_features), jnp.float32)
    adj = jax.random.uniform(k_adj, (n_nodes, n_nodes), jnp.float32)
    weight, bias = init_params(k_param, in_features, out_features)

    out = graph_convolution2(x, adj, weight)
    out = jax.block_until_ready(out)

    # Reference check in plain JAX (f32); bf16 inputs -> loose tolerance.
    ref = adj @ (x @ weight)
    assert out.shape == (n_nodes, out_features)
    rel_err = jnp.max(jnp.abs(out - ref)) / (jnp.max(jnp.abs(ref)) + 1e-6)
    assert rel_err < 2e-2, f"mismatch vs reference (rel err {rel_err})"

    print("KERNEL_OK")
</pallas_src>

<mosaic_0001>
module attributes {stable_mosaic.version = 11 : i64} {
  func.func @_small_matmul_kernel(%arg0: i32, %arg1: memref<64x16xf32, #tpu.memory_space<vmem>>, %arg2: memref<16x128xf32, #tpu.memory_space<vmem>>, %arg3: memref<64x128xbf16, #tpu.memory_space<vmem>>) attributes {dimension_semantics = [#tpu.dimension_semantics<arbitrary>], iteration_bounds = array<i64: 1>, scalar_prefetch = 0 : i64, scratch_operands = 0 : i64, tpu.core_type = #tpu.core_type<tc>, window_params = [{pipeline_mode = #tpu.pipeline_mode<synchronous>, transform_indices = @transform_0, window_bounds = array<i64: 64, 16>}, {pipeline_mode = #tpu.pipeline_mode<synchronous>, transform_indices = @transform_1, window_bounds = array<i64: 16, 128>}, {pipeline_mode = #tpu.pipeline_mode<synchronous>, transform_indices = @transform_2, window_bounds = array<i64: 64, 128>}]} {
    %c0 = arith.constant 0 : index
    %c0_0 = arith.constant 0 : index
    %0 = vector.load %arg1[%c0, %c0_0] : memref<64x16xf32, #tpu.memory_space<vmem>>, vector<64x16xf32>
    %c0_1 = arith.constant 0 : index
    %c0_2 = arith.constant 0 : index
    %1 = vector.load %arg2[%c0_1, %c0_2] : memref<16x128xf32, #tpu.memory_space<vmem>>, vector<16x128xf32>
    %cst = arith.constant dense<0.000000e+00> : vector<64x128xf32>
    %2 = tpu.matmul %0, %1, %cst {dimension_numbers = #tpu.dot_dimension_numbers<[1], [0], [0], [1], [0, 0, 1, 1], [], []>} : vector<64x16xf32>, vector<16x128xf32>, vector<64x128xf32> -> vector<64x128xf32>
    %3 = arith.truncf %2 : vector<64x128xf32> to vector<64x128xbf16>
    %c0_3 = arith.constant 0 : index
    %c0_4 = arith.constant 0 : index
    %4 = vector.load %arg3[%c0_3, %c0_4] : memref<64x128xbf16, #tpu.memory_space<vmem>>, vector<64x128xbf16>
    tpu.vector_store %arg3[%c0_3, %c0_4], %3 {strides = array<i32>} : memref<64x128xbf16, #tpu.memory_space<vmem>>, vector<64x128xbf16>,
    return
  }
  func.func @transform_0(%arg0: i32) -> (i32, i32) {
    %c0_i32 = arith.constant 0 : i32
    %c0_i32_0 = arith.constant 0 : i32
    %c0_i32_1 = arith.constant 0 : i32
    return %c0_i32, %c0_i32_0 : i32, i32
  }
  func.func @transform_1(%arg0: i32) -> (i32, i32) {
    %c0_i32 = arith.constant 0 : i32
    %c0_i32_0 = arith.constant 0 : i32
    %c0_i32_1 = arith.constant 0 : i32
    return %c0_i32, %c0_i32_0 : i32, i32
  }
  func.func @transform_2(%arg0: i32) -> (i32, i32) {
    %c0_i32 = arith.constant 0 : i32
    %c0_i32_0 = arith.constant 0 : i32
    %c0_i32_1 = arith.constant 0 : i32
    return %c0_i32, %c0_i32_0 : i32, i32
  }
}

module attributes {stable_mosaic.version = 11 : i64} {
  func.func @_adj_matmul_resident_kernel(%arg0: i32, %arg1: memref<32x64xbf16, #tpu.memory_space<vmem>>, %arg2: memref<64x128xbf16, #tpu.memory_space<vmem>>, %arg3: memref<32x128xf32, #tpu.memory_space<vmem>>) attributes {dimension_semantics = [#tpu.dimension_semantics<parallel>], iteration_bounds = array<i64: 2>, scalar_prefetch = 0 : i64, scratch_operands = 0 : i64, tpu.core_type = #tpu.core_type<tc>, window_params = [{transform_indices = @transform_0, window_bounds = array<i64: 32, 64>}, {pipeline_mode = #tpu.pipeline_mode<synchronous>, transform_indices = @transform_1, window_bounds = array<i64: 64, 128>}, {transform_indices = @transform_2, window_bounds = array<i64: 32, 128>}]} {
    %c0 = arith.constant 0 : index
    %c0_0 = arith.constant 0 : index
    %0 = vector.load %arg1[%c0, %c0_0] : memref<32x64xbf16, #tpu.memory_space<vmem>>, vector<32x64xbf16>
    %c0_1 = arith.constant 0 : index
    %c0_2 = arith.constant 0 : index
    %1 = vector.load %arg2[%c0_1, %c0_2] : memref<64x128xbf16, #tpu.memory_space<vmem>>, vector<64x128xbf16>
    %cst = arith.constant dense<0.000000e+00> : vector<32x128xf32>
    %2 = tpu.matmul %0, %1, %cst {dimension_numbers = #tpu.dot_dimension_numbers<[1], [0], [0], [1], [0, 0, 1, 1], [], []>} : vector<32x64xbf16>, vector<64x128xbf16>, vector<32x128xf32> -> vector<32x128xf32>
    %c0_3 = arith.constant 0 : index
    %c0_4 = arith.constant 0 : index
    %3 = vector.load %arg3[%c0_3, %c0_4] : memref<32x128xf32, #tpu.memory_space<vmem>>, vector<32x128xf32>
    tpu.vector_store %arg3[%c0_3, %c0_4], %2 {strides = array<i32>} : memref<32x128xf32, #tpu.memory_space<vmem>>, vector<32x128xf32>,
    return
  }
  func.func @transform_0(%arg0: i32) -> (i32, i32) {
    %c0_i32 = arith.constant 0 : i32
    %c0_i32_0 = arith.constant 0 : i32
    return %arg0, %c0_i32 : i32, i32
  }
  func.func @transform_1(%arg0: i32) -> (i32, i32) {
    %c0_i32 = arith.constant 0 : i32
    %c0_i32_0 = arith.constant 0 : i32
    %c0_i32_1 = arith.constant 0 : i32
    return %c0_i32, %c0_i32_0 : i32, i32
  }
  func.func @transform_2(%arg0: i32) -> (i32, i32) {
    %c0_i32 = arith.constant 0 : i32
    %c0_i32_0 = arith.constant 0 : i32
    return %arg0, %c0_i32 : i32, i32
  }
}

</mosaic_0001>

<bundles_post_ra>
// kernel: graph_convolution2.3
= control target key start
LH: loop header
LB: loop body
LE: loop exit
PB: predicated region body
PF: predicated region fallthrough
CT: control target
= control target key end

     0   :  { %s358_s9 = smov 0   ;;  %s387_s0 = inlined_call_operand.vmem [shape: bf16[64,64], index: 0, kind: input, shape index: {}]   ;;  %s388_s1 = inlined_call_operand.vmem [shape: bf16[64,128], index: 1, kind: input, shape index: {}]   ;;  %s389_s2 = inlined_call_operand.vmem [shape: f32[64,128], index: 2, kind: output, shape index: {}]  }
   0x1 LB: > { %s280_s10 = sadd.s32 4294967295, %s341_s9   ;;  %p284_p0 = scmp.ge.s32.totalorder %s341_s9, 1  ;;  %s341_s9 = sphi %s358_s9, %s12_s9  }
   0x2   : > { %p113_p1 = scmp.lt.s32.totalorder %s341_s9, 3 }
   0x4   : > { %p114_p2 = pnand %p284_p0, %p113_p1 }
   0x5   : > { %s285_s13 = sshll.u32 (!%p114_p2), %s280_s10, 2 }
   0x6   : > { %117 = sbr.rel (%p114_p2) target bundleno = 163 (0xa3), region = 28  ;;  %p136_p3 = scmp.lt.s32.totalorder (!%p114_p2), %s285_s13, 7 }
   0xb   : > { %v322_v0 = vld [vmem:[%s388_s1 + $0x18] sm:$0xff]  ;;  %v321_v1 = vld [vmem:[%s388_s1 + $0x10] sm:$0xff]  ;;  %s391_s13 = smov (!%p136_p3, %s285_s13), 7  ;;  %v320_v2 = vld [vmem:[%s388_s1 + $0x8] sm:$0xff]  ;;  %vm194_vm0 = vcmask 523264  }
   0xc   : > { %205 = vmatpush.bf16.msra.mxu0 %v322_v0  ;;  %323 = vmatpush.bf16.msra.mxu1 %v322_v0  ;;  %s286_s18 = sshll.u32 %s391_s13, 2  ;;  %v319_v3 = vld [vmem:[%s388_s1] sm:$0xff]  ;;  %s288_s24 = sshll.u32 %s391_s13, 3 }
   0xd   : > { %s139_s23 = scalar_lea.vmem %s387_s0, %s286_s18  ;;  %s145_s27 = scalar_lea.vmem %s389_s2, %s288_s24 }
   0xe   : > { %v317_v4 = vld [vmem:[%s139_s23] sm:$0xff]  ;;  %v318_v5 = vld [vmem:[%s139_s23 + $0x8] sm:$0xff] }
  0x10   : > { %206 = vmatpush.bf16.msra.mxu0 %v321_v1  ;;  %324 = vmatpush.bf16.msra.mxu1 %v321_v1 }
  0x14   : > { %207 = vmatpush.bf16.msra.mxu0 %v320_v2  ;;  %325 = vmatpush.bf16.msra.mxu1 %v320_v2 }
  0x18   : > { %208 = vmatpush.bf16.msra.mxu0 %v319_v3  ;;  %326 = vmatpush.bf16.msra.mxu1 %v319_v3 }
  0x1b   : > { %313 = vmatmul.msk.bf16.vlgmr.msra.gmra.mxu0 %vm194_vm0, %v317_v4  ;;  %314 = vmatmul.msk.bf16.vlgmr.msra.gmra.mxu1 %vm194_vm0, %v318_v5 }
  0x98   : > { %v210_v6 = vpop.f32.mrf.mxu0  ;;  %v215_v7 = vpop.f32.mrf.mxu1 }
  0x99   : > { %220 = vst [vmem:[%s145_s27] sm:$0xff] %v210_v6 }
  0x9a   : > { %222 = vst [vmem:[%s145_s27 + $0x10] sm:$0xff] %v215_v7 }
  0xa0   : > { %v212_v8 = vpop.f32.mrf.mxu0  ;;  %v217_v9 = vpop.f32.mrf.mxu1 }
  0xa1   : > { %221 = vst [vmem:[%s145_s27 + $0x8] sm:$0xff] %v212_v8 }
  0xa2   : > { %223 = vst [vmem:[%s145_s27 + $0x18] sm:$0xff] %v217_v9 }
  0xa3 PF: > { %s12_s9 = sadd.s32 1, %s341_s9  }
  0xa4   : > { %p9_p4 = scmp.ge.s32.totalorder %s12_s9, 4  }
  0xa6   :  { %11 = sbr.rel (!%p9_p4) target bundleno = 1 (0x1), region = 58 }

// kernel: graph_convolution2.2
= control target key start
LH: loop header
LB: loop body
LE: loop exit
PB: predicated region body
PF: predicated region fallthrough
CT: control target
= control target key end

     0   :  { %vm21_vm0 = vcmask 130048   ;;  %s209_s1 = inlined_call_operand.vmem [shape: f32[16,128], index: 1, kind: input, shape index: {}]   ;;  %s210_s0 = inlined_call_operand.vmem [shape: f32[64,16], index: 0, kind: input, shape index: {}]   ;;  %s211_s2 = inlined_call_operand.vmem [shape: bf16[64,128], index: 2, kind: output, shape index: {}]  }
   0x1   :  { %v20_v0 = vld [vmem:[%s209_s1 + $0x8] sm:$0xff]  ;;  %v19_v1 = vld [vmem:[%s209_s1] sm:$0xff]  ;;  %v13_v3 = vld [vmem:[%s210_s0 + $0x10] sm:$0xff] }
   0x2   :  { %60 = vmatpush.msra.mxu0 %v20_v0  ;;  %138 = vmatpush.msra.mxu1 %v20_v0  ;;  %v11_v2 = vld [vmem:[%s210_s0] sm:$0xff]  ;;  %v17_v5 = vld [vmem:[%s210_s0 + $0x30] sm:$0xff]  ;;  %v12_v6 = vld [vmem:[%s210_s0 + $0x8] sm:$0xff] }
   0x3   :  { %139 = vmatpush.msra.mxu2 %v20_v0  ;;  %140 = vmatpush.msra.mxu3 %v20_v0  ;;  %v15_v4 = vld [vmem:[%s210_s0 + $0x20] sm:$0xff]  ;;  %v14_v7 = vld [vmem:[%s210_s0 + $0x18] sm:$0xff]  ;;  %v16_v8 = vld [vmem:[%s210_s0 + $0x28] sm:$0xff] }
   0x4   :  { %61 = vmatpush.msra.mxu0 %v19_v1  ;;  %141 = vmatpush.msra.mxu1 %v19_v1  ;;  %v18_v9 = vld [vmem:[%s210_s0 + $0x38] sm:$0xff] }
   0x5   :  { %142 = vmatpush.msra.mxu2 %v19_v1  ;;  %143 = vmatpush.msra.mxu3 %v19_v1 }
   0x6   :  { %107 = vmatmul.msk.f32.vlgmr.msra.gmra.mxu0 %vm21_vm0, %v11_v2  ;;  %109 = vmatmul.msk.f32.vlgmr.msra.gmra.mxu1 %vm21_vm0, %v13_v3 }
   0x7   :  { %111 = vmatmul.msk.f32.vlgmr.msra.gmra.mxu2 %vm21_vm0, %v15_v4  ;;  %113 = vmatmul.msk.f32.vlgmr.msra.gmra.mxu3 %vm21_vm0, %v17_v5 }
   0xe   :  { %108 = vmatmul.msk.f32.gmra.mxu0 %vm21_vm0, %v12_v6  ;;  %110 = vmatmul.msk.f32.gmra.mxu1 %vm21_vm0, %v14_v7 }
   0xf   :  { %112 = vmatmul.msk.f32.gmra.mxu2 %vm21_vm0, %v16_v8  ;;  %114 = vmatmul.msk.f32.gmra.mxu3 %vm21_vm0, %v18_v9 }
  0x83   :  { %v63_v10 = vpop.f32.mrf.mxu0  ;;  %v69_v11 = vpop.f32.mrf.mxu1 }
  0x8a   :  { %v75_v12 = vpop.f32.mrf.mxu2  ;;  %v81_v13 = vpop.f32.mrf.mxu3 }
  0x8b   :  { %v66_v14 = vpop.f32.mrf.mxu0  ;;  %v72_v15 = vpop.f32.mrf.mxu1 }
  0x8c   :  { %v118_v16 = vpack.c.bf16 %v66_v14, %v63_v10  ;;  %v123_v17 = vpack.c.bf16 %v72_v15, %v69_v11 }
  0x8e   :  { %119 = vst [vmem:[%s211_s2] sm:$0xff] %v118_v16  }
  0x8f   :  { %135 = vst [vmem:[%s211_s2 + $0x8] sm:$0xff] %v123_v17  }
  0x92   :  { %v78_v18 = vpop.f32.mrf.mxu2  ;;  %v84_v19 = vpop.f32.mrf.mxu3 }
  0x93   :  { %v128_v20 = vpack.c.bf16 %v78_v18, %v75_v12  ;;  %v133_v21 = vpack.c.bf16 %v84_v19, %v81_v13 }
  0x95   :  { %136 = vst [vmem:[%s211_s2 + $0x10] sm:$0xff] %v128_v20  }
  0x96   :  { %137 = vst [vmem:[%s211_s2 + $0x18] sm:$0xff] %v133_v21  }

</bundles_post_ra>
